<compile_context>
chip_gen: v7x
topology: tpu7x:2x2x1
jax: 0.10.0
libtpu: 0.0.40
codegen_flags: <defaults>
</compile_context>

<pallas_src>
import jax
import jax.numpy as jnp
from jax.experimental import pallas as pl
from jax.experimental.pallas import tpu as pltpu

INPUT_DIM = 17
HIDDEN_DIMS = (256, 128, 64)

# Fused layer widths / segment offsets.
_S1, _D1, _C1 = 64, HIDDEN_DIMS[0], 128          # layer-1 branch widths
_S2, _D2, _C2 = 32, HIDDEN_DIMS[1], 64           # layer-2 branch widths
_N1 = _S1 + _D1 + _C1                            # 448
_N2 = _S2 + _D2 + _C2                            # 224
_N3 = 4 + 4 + 4                                  # 12 (size branch duplicated x4)

_TILE_B_CAP = 2048                               # bf16 operands -> fits 32 MiB VMEM
_VMEM_LIMIT_BYTES = 32 * 1024 * 1024             # explicit; raises v5e's 16 MiB default


# -----------------------------------------------------------------------------
# Kernel: one batch tile, all weights VMEM-resident, three fused matmuls.
#   layers 1-2: bf16 x bf16 -> f32 accumulate (MXU-native on v5e/v6e/v7x)
#   layer 3   : f32 (tiny; keeps precision ahead of exp/sigmoid/softplus)
# -----------------------------------------------------------------------------
def _adaptive_mlp_v2_kernel(feat_ref, w1_ref, b1_ref, w2_ref, b2_ref,
                            w3_ref, b3_ref, out_ref):
    x = feat_ref[...].astype(jnp.bfloat16)                             # [Tb, 17]

    h1 = jnp.maximum(
        jnp.dot(x, w1_ref[...], preferred_element_type=jnp.float32) + b1_ref[...],
        0.0)                                                           # [Tb, 448] f32
    h2 = jnp.maximum(
        jnp.dot(h1.astype(jnp.bfloat16), w2_ref[...],
                preferred_element_type=jnp.float32) + b2_ref[...],
        0.0)                                                           # [Tb, 224] f32
    y3 = jnp.dot(h2, w3_ref[...], preferred_element_type=jnp.float32) + b3_ref[...]
    # y3: [Tb, 12] = [size(4 dup cols) | difficulty(4) | coverage(4)]

    size_factor = jnp.logaddexp(y3[:, 0:4], 0.0) + 1.0                 # softplus + 1
    difficulty  = jax.nn.sigmoid(y3[:, 4:8]) * 2.0 + 0.5
    base_widths = jnp.exp(y3[:, 8:12])

    out_ref[...] = base_widths * size_factor * difficulty              # [Tb, 4]


# -----------------------------------------------------------------------------
# Parameter init (mirrors AdaptiveMLPV2._initialize_weights) + fusion/packing.
# -----------------------------------------------------------------------------
def _xavier_normal(key, fan_in, fan_out, std=None):
    if std is None:
        std = (2.0 / (fan_in + fan_out)) ** 0.5
    return jax.random.normal(key, (fan_in, fan_out), jnp.float32) * std


def init_params(key):
    """Raw per-layer params matching the PyTorch module (stored [in, out])."""
    ks = jax.random.split(key, 16)
    p = {}
    # size_net: Linear(4,64) ReLU Linear(64,32) ReLU Linear(32,1) Softplus
    p["s_w1"] = _xavier_normal(ks[0], 4, 64)
    p["s_b1"] = jnp.zeros((1, 64), jnp.float32)
    p["s_w2"] = _xavier_normal(ks[1], 64, 32)
    p["s_b2"] = jnp.zeros((1, 32), jnp.float32)
    p["s_w3"] = _xavier_normal(ks[2], 32, 1)
    p["s_b3"] = jnp.full((1, 1), 0.5, jnp.float32)           # bias filled with 0.5
    # difficulty_net: Linear(17,256) ReLU (Dropout) Linear(256,128) ReLU Linear(128,4) Sigmoid
    p["d_w1"] = _xavier_normal(ks[3], INPUT_DIM, HIDDEN_DIMS[0])
    p["d_b1"] = jnp.zeros((1, HIDDEN_DIMS[0]), jnp.float32)
    p["d_w2"] = _xavier_normal(ks[4], HIDDEN_DIMS[0], HIDDEN_DIMS[1])
    p["d_b2"] = jnp.zeros((1, HIDDEN_DIMS[1]), jnp.float32)
    p["d_w3"] = _xavier_normal(ks[5], HIDDEN_DIMS[1], 4)
    p["d_b3"] = jnp.zeros((1, 4), jnp.float32)                # bias filled with 0.0
    # coverage_conditioner: Linear(18,128) ReLU Linear(128,64) ReLU Linear(64,4)
    p["c_w1"] = _xavier_normal(ks[6], INPUT_DIM + 1, 128)
    p["c_b1"] = jnp.zeros((1, 128), jnp.float32)
    p["c_w2"] = _xavier_normal(ks[7], 128, 64)
    p["c_b2"] = jnp.zeros((1, 64), jnp.float32)
    p["c_w3"] = _xavier_normal(ks[8], 64, 4, std=0.2)         # normal std=0.2
    p["c_b3"] = jax.random.normal(ks[9], (1, 4), jnp.float32) * 0.5   # randn*0.5
    return p


def pack_params(p):
    """Build fused/padded weights once (outside the per-call path).

    w1/w2 are stored bf16 (MXU-native operands); w3 and all biases stay f32.
    """
    o1s, o1d, o1c = 0, _S1, _S1 + _D1                  # layer-1 column offsets
    o2s, o2d, o2c = 0, _S2, _S2 + _D2                  # layer-2 column offsets

    w1 = jnp.zeros((INPUT_DIM, _N1), jnp.float32)
    w1 = w1.at[0:4, o1s:o1s + _S1].set(p["s_w1"])                 # size sees box only
    w1 = w1.at[:, o1d:o1d + _D1].set(p["d_w1"])
    w1 = w1.at[:, o1c:o1c + _C1].set(p["c_w1"][:INPUT_DIM, :])
    b1_base = jnp.concatenate([p["s_b1"], p["d_b1"], p["c_b1"]], axis=1)
    cov_row = jnp.zeros((1, _N1), jnp.float32)
    cov_row = cov_row.at[:, o1c:o1c + _C1].set(p["c_w1"][INPUT_DIM:INPUT_DIM + 1, :])

    w2 = jnp.zeros((_N1, _N2), jnp.float32)
    w2 = w2.at[o1s:o1s + _S1, o2s:o2s + _S2].set(p["s_w2"])
    w2 = w2.at[o1d:o1d + _D1, o2d:o2d + _D2].set(p["d_w2"])
    w2 = w2.at[o1c:o1c + _C1, o2c:o2c + _C2].set(p["c_w2"])
    b2 = jnp.concatenate([p["s_b2"], p["d_b2"], p["c_b2"]], axis=1)

    w3 = jnp.zeros((_N2, _N3), jnp.float32)
    w3 = w3.at[o2s:o2s + _S2, 0:4].set(jnp.tile(p["s_w3"], (1, 4)))   # dup size col
    w3 = w3.at[o2d:o2d + _D2, 4:8].set(p["d_w3"])
    w3 = w3.at[o2c:o2c + _C2, 8:12].set(p["c_w3"])
    b3 = jnp.concatenate([jnp.tile(p["s_b3"], (1, 4)), p["d_b3"], p["c_b3"]], axis=1)

    return {"w1": w1.astype(jnp.bfloat16), "b1_base": b1_base, "cov_row": cov_row,
            "w2": w2.astype(jnp.bfloat16), "b2": b2,
            "w3": w3, "b3": b3}


# -----------------------------------------------------------------------------
# Wrapper: batch grid + coverage folding.
# -----------------------------------------------------------------------------
def _choose_tile_b(b):
    """Batch tile: multiple of 8, >=2 grid steps when b > 8 (both v7x TCs),
    capped at 2048 (fits the 32 MiB scoped-VMEM budget in bf16 on all gens)."""
    b8 = max(8, ((b + 7) // 8) * 8)
    if b8 <= 8:
        return 8
    half = ((b8 // 2) + 7) // 8 * 8        # round_up(ceil(b/2), 8) -> >=2 steps
    return min(_TILE_B_CAP, half)


@jax.jit
def adaptive_mlp_v2_forward(features, fused, target_coverage=0.9):
    """features: [B, 17] float32 -> widths [B, 4] float32 (eval-mode forward).

    target_coverage is a traced scalar (no recompile per coverage value); it is
    folded into the fused layer-1 bias (f32) outside the kernel.
    """
    b = features.shape[0]
    cov = jnp.asarray(target_coverage, features.dtype)
    b1 = fused["b1_base"] + cov * fused["cov_row"]        # fold coverage into bias

    tile_b = _choose_tile_b(b)
    bp = ((b + tile_b - 1) // tile_b) * tile_b
    feats = features if bp == b else jnp.pad(features, ((0, bp - b), (0, 0)))

    weight_bytes = (INPUT_DIM * _N1 * 2 + _N1 * _N2 * 2 + _N2 * _N3 * 4
                    + (_N1 + _N2 + _N3) * 4)
    cost = pl.CostEstimate(
        flops=2 * bp * (INPUT_DIM * _N1 + _N1 * _N2 + _N2 * _N3),
        transcendentals=20 * bp,                      # softplus/sigmoid/exp epilogue
        bytes_accessed=bp * (INPUT_DIM + 4) * 4 + weight_bytes)

    out = pl.pallas_call(
        _adaptive_mlp_v2_kernel,
        out_shape=jax.ShapeDtypeStruct((bp, 4), jnp.float32),
        grid=(pl.cdiv(bp, tile_b),),
        in_specs=[
            pl.BlockSpec((tile_b, INPUT_DIM), lambda i: (i, 0)),   # activations
            pl.BlockSpec((INPUT_DIM, _N1), lambda i: (0, 0)),      # fused weights
            pl.BlockSpec((1, _N1), lambda i: (0, 0)),
            pl.BlockSpec((_N1, _N2), lambda i: (0, 0)),
            pl.BlockSpec((1, _N2), lambda i: (0, 0)),
            pl.BlockSpec((_N2, _N3), lambda i: (0, 0)),
            pl.BlockSpec((1, _N3), lambda i: (0, 0)),
        ],
        out_specs=pl.BlockSpec((tile_b, 4), lambda i: (i, 0)),
        compiler_params=pltpu.CompilerParams(
            dimension_semantics=("parallel",),
            vmem_limit_bytes=_VMEM_LIMIT_BYTES),
        cost_estimate=cost,
    )(feats, fused["w1"], b1, fused["w2"], fused["b2"], fused["w3"], fused["b3"])

    return out[:b]


# -----------------------------------------------------------------------------
# References.
#   _reference_forward       : pure-f32, per-branch (mirrors PyTorch eval mode).
#   _fused_reference_forward : same math/precision as the kernel, in plain jnp
#                              (validates packing + pallas machinery tightly).
# -----------------------------------------------------------------------------
def _reference_forward(features, params, target_coverage=0.9):
    def dense(x, w, b):
        return x @ w + b
    x = features
    h = jax.nn.relu(dense(x[:, :4], params["s_w1"], params["s_b1"]))
    h = jax.nn.relu(dense(h, params["s_w2"], params["s_b2"]))
    size_factor = jax.nn.softplus(dense(h, params["s_w3"], params["s_b3"])) + 1.0
    h = jax.nn.relu(dense(x, params["d_w1"], params["d_b1"]))
    h = jax.nn.relu(dense(h, params["d_w2"], params["d_b2"]))
    difficulty = jax.nn.sigmoid(dense(h, params["d_w3"], params["d_b3"])) * 2.0 + 0.5
    cov = jnp.full((x.shape[0], 1), target_coverage, x.dtype)
    ci = jnp.concatenate([x, cov], axis=1)
    h = jax.nn.relu(dense(ci, params["c_w1"], params["c_b1"]))
    h = jax.nn.relu(dense(h, params["c_w2"], params["c_b2"]))
    base = jnp.exp(dense(h, params["c_w3"], params["c_b3"]))
    return base * size_factor * difficulty


def _fused_reference_forward(features, fused, target_coverage=0.9):
    cov = jnp.asarray(target_coverage, features.dtype)
    b1 = fused["b1_base"] + cov * fused["cov_row"]
    x = features.astype(jnp.bfloat16)
    h1 = jnp.maximum(
        jnp.dot(x, fused["w1"], preferred_element_type=jnp.float32) + b1, 0.0)
    h2 = jnp.maximum(
        jnp.dot(h1.astype(jnp.bfloat16), fused["w2"],
                preferred_element_type=jnp.float32) + fused["b2"], 0.0)
    y3 = jnp.dot(h2, fused["w3"], preferred_element_type=jnp.float32) + fused["b3"]
    size_factor = jnp.logaddexp(y3[:, 0:4], 0.0) + 1.0
    difficulty = jax.nn.sigmoid(y3[:, 4:8]) * 2.0 + 0.5
    return jnp.exp(y3[:, 8:12]) * size_factor * difficulty


# TODO(synk): nn.Dropout(0.1) and the training-time |noise| branch are
# eval-mode no-ops and are intentionally not implemented.

if __name__ == "__main__":
    key = jax.random.PRNGKey(0)
    pkey, xkey1, xkey2, xkey3 = jax.random.split(key, 4)
    params = init_params(pkey)
    fused = pack_params(params)

    # batch=8: single tile; batch=13: remainder/padding path; batch=40: multi-step grid.
    ok = True
    for batch, xkey in ((8, xkey1), (13, xkey2), (40, xkey3)):
        features = jax.random.normal(xkey, (batch, INPUT_DIM), jnp.float32)
        widths = adaptive_mlp_v2_forward(features, fused, 0.9)
        widths = jax.block_until_ready(widths)
        assert widths.shape == (batch, 4)
        assert bool(jnp.all(jnp.isfinite(widths)))

        # Tight: kernel vs identical-precision fused reference (kernel correctness).
        ref_fused = _fused_reference_forward(features, fused, 0.9)
        ok &= bool(jnp.allclose(widths, ref_fused, rtol=2e-3, atol=2e-4))

        # Loose: kernel vs pure-f32 per-branch reference (bf16 approximation budget).
        ref_f32 = _reference_forward(features, params, target_coverage=0.9)
        ok &= bool(jnp.allclose(widths, ref_f32, rtol=5e-2, atol=5e-3))

    assert ok, "mismatch vs reference"
    print("KERNEL_OK")
</pallas_src>

<mosaic_0001>
module attributes {stable_mosaic.version = 11 : i64} {
  func.func @_adaptive_mlp_v2_kernel(%arg0: i32, %arg1: memref<8x17xf32, #tpu.memory_space<vmem>>, %arg2: memref<17x448xbf16, #tpu.memory_space<vmem>>, %arg3: memref<1x448xf32, #tpu.memory_space<vmem>>, %arg4: memref<448x224xbf16, #tpu.memory_space<vmem>>, %arg5: memref<1x224xf32, #tpu.memory_space<vmem>>, %arg6: memref<224x12xf32, #tpu.memory_space<vmem>>, %arg7: memref<1x12xf32, #tpu.memory_space<vmem>>, %arg8: memref<8x4xf32, #tpu.memory_space<vmem>>) attributes {dimension_semantics = [#tpu.dimension_semantics<parallel>], iteration_bounds = array<i64: 1>, scalar_prefetch = 0 : i64, scratch_operands = 0 : i64, tpu.core_type = #tpu.core_type<tc>, window_params = [{transform_indices = @transform_0, window_bounds = array<i64: 8, 17>}, {pipeline_mode = #tpu.pipeline_mode<synchronous>, transform_indices = @transform_1, window_bounds = array<i64: 17, 448>}, {pipeline_mode = #tpu.pipeline_mode<synchronous>, transform_indices = @transform_2, window_bounds = array<i64: 1, 448>}, {pipeline_mode = #tpu.pipeline_mode<synchronous>, transform_indices = @transform_3, window_bounds = array<i64: 448, 224>}, {pipeline_mode = #tpu.pipeline_mode<synchronous>, transform_indices = @transform_4, window_bounds = array<i64: 1, 224>}, {pipeline_mode = #tpu.pipeline_mode<synchronous>, transform_indices = @transform_5, window_bounds = array<i64: 224, 12>}, {pipeline_mode = #tpu.pipeline_mode<synchronous>, transform_indices = @transform_6, window_bounds = array<i64: 1, 12>}, {transform_indices = @transform_7, window_bounds = array<i64: 8, 4>}]} {
    %c0 = arith.constant 0 : index
    %c0_0 = arith.constant 0 : index
    %0 = vector.load %arg1[%c0, %c0_0] : memref<8x17xf32, #tpu.memory_space<vmem>>, vector<8x17xf32>
    %1 = arith.truncf %0 : vector<8x17xf32> to vector<8x17xbf16>
    %c0_1 = arith.constant 0 : index
    %c0_2 = arith.constant 0 : index
    %2 = vector.load %arg2[%c0_1, %c0_2] : memref<17x448xbf16, #tpu.memory_space<vmem>>, vector<17x448xbf16>
    %cst = arith.constant dense<0.000000e+00> : vector<8x448xf32>
    %3 = tpu.matmul %1, %2, %cst {dimension_numbers = #tpu.dot_dimension_numbers<[1], [0], [0], [1], [0, 0, 1, 1], [], []>} : vector<8x17xbf16>, vector<17x448xbf16>, vector<8x448xf32> -> vector<8x448xf32>
    %c0_3 = arith.constant 0 : index
    %c0_4 = arith.constant 0 : index
    %4 = vector.load %arg3[%c0_3, %c0_4] : memref<1x448xf32, #tpu.memory_space<vmem>>, vector<1x448xf32>
    %5 = vector.broadcast %4 : vector<1x448xf32> to vector<8x448xf32>
    %6 = arith.addf %3, %5 : vector<8x448xf32>
    %cst_5 = arith.constant 0.000000e+00 : f32
    %7 = vector.broadcast %cst_5 : f32 to vector<8x448xf32>
    %8 = arith.maximumf %6, %7 : vector<8x448xf32>
    %9 = arith.truncf %8 : vector<8x448xf32> to vector<8x448xbf16>
    %c0_6 = arith.constant 0 : index
    %c0_7 = arith.constant 0 : index
    %10 = vector.load %arg4[%c0_6, %c0_7] : memref<448x224xbf16, #tpu.memory_space<vmem>>, vector<448x224xbf16>
    %cst_8 = arith.constant dense<0.000000e+00> : vector<8x224xf32>
    %11 = tpu.matmul %9, %10, %cst_8 {dimension_numbers = #tpu.dot_dimension_numbers<[1], [0], [0], [1], [0, 0, 1, 1], [], []>} : vector<8x448xbf16>, vector<448x224xbf16>, vector<8x224xf32> -> vector<8x224xf32>
    %c0_9 = arith.constant 0 : index
    %c0_10 = arith.constant 0 : index
    %12 = vector.load %arg5[%c0_9, %c0_10] : memref<1x224xf32, #tpu.memory_space<vmem>>, vector<1x224xf32>
    %13 = vector.broadcast %12 : vector<1x224xf32> to vector<8x224xf32>
    %14 = arith.addf %11, %13 : vector<8x224xf32>
    %cst_11 = arith.constant 0.000000e+00 : f32
    %15 = vector.broadcast %cst_11 : f32 to vector<8x224xf32>
    %16 = arith.maximumf %14, %15 : vector<8x224xf32>
    %c0_12 = arith.constant 0 : index
    %c0_13 = arith.constant 0 : index
    %17 = vector.load %arg6[%c0_12, %c0_13] : memref<224x12xf32, #tpu.memory_space<vmem>>, vector<224x12xf32>
    %cst_14 = arith.constant dense<0.000000e+00> : vector<8x12xf32>
    %18 = tpu.matmul %16, %17, %cst_14 {dimension_numbers = #tpu.dot_dimension_numbers<[1], [0], [0], [1], [0, 0, 1, 1], [], []>} : vector<8x224xf32>, vector<224x12xf32>, vector<8x12xf32> -> vector<8x12xf32>
    %c0_15 = arith.constant 0 : index
    %c0_16 = arith.constant 0 : index
    %19 = vector.load %arg7[%c0_15, %c0_16] : memref<1x12xf32, #tpu.memory_space<vmem>>, vector<1x12xf32>
    %20 = vector.broadcast %19 : vector<1x12xf32> to vector<8x12xf32>
    %21 = arith.addf %18, %20 : vector<8x12xf32>
    %22 = vector.extract_strided_slice %21 {offsets = [0, 0], sizes = [8, 4], strides = [1, 1]} : vector<8x12xf32> to vector<8x4xf32>
    %cst_17 = arith.constant 0.000000e+00 : f32
    %23 = vector.broadcast %cst_17 : f32 to vector<8x4xf32>
    %24 = arith.maximumf %22, %23 : vector<8x4xf32>
    %25 = vector.broadcast %cst_17 : f32 to vector<8x4xf32>
    %26 = arith.subf %22, %25 : vector<8x4xf32>
    %27 = arith.cmpf one, %26, %26 : vector<8x4xf32>
    %28 = vector.broadcast %cst_17 : f32 to vector<8x4xf32>
    %29 = arith.addf %22, %28 : vector<8x4xf32>
    %30 = math.absf %26 : vector<8x4xf32>
    %cst_18 = arith.constant 0.000000e+00 : f32
    %31 = vector.broadcast %cst_18 : f32 to vector<8x4xf32>
    %32 = arith.subf %31, %30 : vector<8x4xf32>
    %33 = math.exp %32 : vector<8x4xf32>
    %34 = math.log1p %33 : vector<8x4xf32>
    %35 = arith.addf %24, %34 : vector<8x4xf32>
    %36 = arith.select %27, %29, %35 : vector<8x4xi1>, vector<8x4xf32>
    %cst_19 = arith.constant 1.000000e+00 : f32
    %37 = vector.broadcast %cst_19 : f32 to vector<8x4xf32>
    %38 = arith.addf %36, %37 : vector<8x4xf32>
    %39 = vector.extract_strided_slice %21 {offsets = [0, 4], sizes = [8, 4], strides = [1, 1]} : vector<8x12xf32> to vector<8x4xf32>
    %40 = arith.negf %39 : vector<8x4xf32>
    %41 = math.exp %40 : vector<8x4xf32>
    %cst_20 = arith.constant 1.000000e+00 : f32
    %42 = vector.broadcast %cst_20 : f32 to vector<8x4xf32>
    %43 = arith.addf %42, %41 : vector<8x4xf32>
    %44 = arith.divf %42, %43 : vector<8x4xf32>
    %cst_21 = arith.constant 2.000000e+00 : f32
    %45 = vector.broadcast %cst_21 : f32 to vector<8x4xf32>
    %46 = arith.mulf %44, %45 : vector<8x4xf32>
    %cst_22 = arith.constant 5.000000e-01 : f32
    %47 = vector.broadcast %cst_22 : f32 to vector<8x4xf32>
    %48 = arith.addf %46, %47 : vector<8x4xf32>
    %49 = vector.extract_strided_slice %21 {offsets = [0, 8], sizes = [8, 4], strides = [1, 1]} : vector<8x12xf32> to vector<8x4xf32>
    %50 = math.exp %49 : vector<8x4xf32>
    %51 = arith.mulf %50, %38 : vector<8x4xf32>
    %52 = arith.mulf %51, %48 : vector<8x4xf32>
    %c0_23 = arith.constant 0 : index
    %c0_24 = arith.constant 0 : index
    %53 = vector.load %arg8[%c0_23, %c0_24] : memref<8x4xf32, #tpu.memory_space<vmem>>, vector<8x4xf32>
    tpu.vector_store %arg8[%c0_23, %c0_24], %52 {strides = array<i32>} : memref<8x4xf32, #tpu.memory_space<vmem>>, vector<8x4xf32>,
    return
  }
  func.func @transform_0(%arg0: i32) -> (i32, i32) {
    %c0_i32 = arith.constant 0 : i32
    %c0_i32_0 = arith.constant 0 : i32
    return %arg0, %c0_i32 : i32, i32
  }
  func.func @transform_1(%arg0: i32) -> (i32, i32) {
    %c0_i32 = arith.constant 0 : i32
    %c0_i32_0 = arith.constant 0 : i32
    %c0_i32_1 = arith.constant 0 : i32
    return %c0_i32, %c0_i32_0 : i32, i32
  }
  func.func @transform_2(%arg0: i32) -> (i32, i32) {
    %c0_i32 = arith.constant 0 : i32
    %c0_i32_0 = arith.constant 0 : i32
    %c0_i32_1 = arith.constant 0 : i32
    return %c0_i32, %c0_i32_0 : i32, i32
  }
  func.func @transform_3(%arg0: i32) -> (i32, i32) {
    %c0_i32 = arith.constant 0 : i32
    %c0_i32_0 = arith.constant 0 : i32
    %c0_i32_1 = arith.constant 0 : i32
    return %c0_i32, %c0_i32_0 : i32, i32
  }
  func.func @transform_4(%arg0: i32) -> (i32, i32) {
    %c0_i32 = arith.constant 0 : i32
    %c0_i32_0 = arith.constant 0 : i32
    %c0_i32_1 = arith.constant 0 : i32
    return %c0_i32, %c0_i32_0 : i32, i32
  }
  func.func @transform_5(%arg0: i32) -> (i32, i32) {
    %c0_i32 = arith.constant 0 : i32
    %c0_i32_0 = arith.constant 0 : i32
    %c0_i32_1 = arith.constant 0 : i32
    return %c0_i32, %c0_i32_0 : i32, i32
  }
  func.func @transform_6(%arg0: i32) -> (i32, i32) {
    %c0_i32 = arith.constant 0 : i32
    %c0_i32_0 = arith.constant 0 : i32
    %c0_i32_1 = arith.constant 0 : i32
    return %c0_i32, %c0_i32_0 : i32, i32
  }
  func.func @transform_7(%arg0: i32) -> (i32, i32) {
    %c0_i32 = arith.constant 0 : i32
    %c0_i32_0 = arith.constant 0 : i32
    return %arg0, %c0_i32 : i32, i32
  }
}

</mosaic_0001>

<bundles_post_ra>
// kernel: adaptive_mlp_v2_forward.1
= control target key start
LH: loop header
LB: loop body
LE: loop exit
PB: predicated region body
PF: predicated region fallthrough
CT: control target
= control target key end

     0   :  { %12 = vsyncpa [#allocation3], 0  ;;  %s1056_s24 = smov [#allocation2]   ;;  %s1264_s0 = inlined_call_operand.vmem [shape: f32[8,17], index: 0, kind: input, shape index: {}]   ;;  %s1265_s1 = inlined_call_operand.vmem [shape: bf16[17,448], index: 1, kind: input, shape index: {}]   ;;  %s1266_s2 = inlined_call_operand.vmem [shape: f32[1,448], index: 2, kind: input, shape index: {}]   ;;  %s1267_s3 = inlined_call_operand.hbm [shape: bf16[448,224], index: 3, kind: input, shape index: {}]   ;;  %s1268_s4 = inlined_call_operand.vmem [shape: f32[1,224], index: 4, kind: input, shape index: {}]   ;;  %s1269_s5 = inlined_call_operand.vmem [shape: f32[224,12], index: 5, kind: input, shape index: {}]   ;;  %s1270_s6 = inlined_call_operand.vmem [shape: f32[1,12], index: 6, kind: input, shape index: {}]   ;;  %s1271_s7 = inlined_call_operand.vmem [shape: f32[8,4], index: 7, kind: output, shape index: {}]  }
   0x1   :  { %s24_s25 = sshll.u32 %s1056_s24, 4  ;;  %s1032_s28 = scalar_lea.hbm %s1267_s3, 7168  ;;  %s25_s25 = int_to_ptr.vmem [resolvable:$true] %s24_s25 }
   0x2   :  { %p1033_p0 = scmp.ne.s32.totalorder %s1267_s3, %s1032_s28  ;;  %p1036_p1 = scmp.lt.u32.totalorder %s1032_s28, %s1267_s3 }
   0x4   :  { %p1038_p2 = pnand %p1036_p1, %p1033_p0 }
   0x6   :  { %1041 = shalt.err (!%p1038_p2)
}
   0x7   :  { %s1042_s10 = scalar_lea.vmem %s25_s25, 7168  ;;  %p1047_p4 = scmp.lt.s32.totalorder %s25_s25, %s25_s25 }
   0x8   :  { %p1043_p3 = scmp.ne.s32.totalorder %s25_s25, %s1042_s10  ;;  %p1048_p5 = scmp.lt.s32.totalorder %s1042_s10, %s1042_s10 }
   0xa   :  { %p1049_p6 = por %p1048_p5, %p1047_p4 }
   0xc   :  { %p1050_p7 = pnand %p1049_p6, %p1043_p3 }
   0xe   :  { %1053 = shalt.err (!%p1050_p7)
}
   0xf   :  { %s1057_s11 = smov 128   ;;  %s1058_s12 = smov 8  }
  0x10   :  { %30 = dma.hbm_to_vmem [thread:$0]  %s1267_s3, 7168, %s25_s25, [#allocation3], %s1057_s11, %s1057_s11, %s1058_s12  }
  0x11   :  { %1054 = dma.done.wait [#allocation3], 7168  }
  0x12   :  { %1055 = vsyncadd [#allocation3], 4294960128  ;;  %v1059_v0 = vmov 0   ;;  %vm105_vm0 = vcmask 1040384   ;;  %v928_v1 = vld [vmem:[%s1265_s1 + $0x4] ss:$16 sps:$4 sm:$0xff]  }
  0x13   :  { %152 = vmatprep.mubr.bf16.mxu0 %v1059_v0  ;;  %v930_v2 = vld [vmem:[%s1265_s1] ss:$16 sps:$4 sm:$0xff]   ;;  %v107_v4 = vsel %vm105_vm0, 65535, %v1059_v0  ;;  %120 = vmatprep.subr.bf16.mxu0 %v928_v1  ;;  %v48_v8 = vld [vmem:[%s1265_s1 + $0x28] sm:$0x11]  ;;  %vm101_vm1 = vcmask 138240  }
  0x14   :  { %v47_v3 = vld [vmem:[%s1265_s1 + $0x20] sm:$0x11]  ;;  %121 = vmatpush1.bf16.msra.mxu0 %v930_v2  ;;  %v935_v11 = vld [vmem:[%s1265_s1 + $0xc] ss:$16 sps:$4 sm:$0xff]   ;;  %v812_v12 = vcombine.high %v48_v8, %v48_v8  ;;  %v933_v14 = vld [vmem:[%s1265_s1 + $0x8] ss:$16 sps:$4 sm:$0xff]   ;;  %v811_v15 = vcombine.low %v48_v8, %v48_v8 }
  0x15   :  { %v810_v5 = vcombine.high %v47_v3, %v47_v3  ;;  %v809_v6 = vcombine.low %v47_v3, %v47_v3  ;;  %v41_v7 = vld [vmem:[%s1264_s0] sm:$0xff]  ;;  %v943_v22 = vld [vmem:[#allocation2 + $0x14] ss:$8 sps:$4 sm:$0xff]   ;;  %v967_v24 = vld [vmem:[#allocation2 + $0x110] ss:$8 sps:$4 sm:$0xff]   ;;  %vm558_vm2 = vcmask 523264  }
  0x16   :  { %v42_v13 = vpack.c.bf16 %v41_v7, %v41_v7  ;;  %v118_v16 = vand.u32 %v812_v12, %v107_v4  ;;  %v115_v17 = vand.u32 %v811_v15, %v107_v4  ;;  %v940_v18 = vld [vmem:[#allocation2 + $0x4] ss:$8 sps:$4 sm:$0xff]   ;;  %v961_v20 = vld [vmem:[#allocation2 + $0x100] ss:$8 sps:$4 sm:$0xff]   ;;  %v965_v23 = vld [vmem:[#allocation2 + $0x114] ss:$8 sps:$4 sm:$0xff]  }
  0x17   :  { %v112_v9 = vand.u32 %v810_v5, %v107_v4  ;;  %v109_v10 = vand.u32 %v809_v6, %v107_v4  ;;  %v959_v19 = vld [vmem:[#allocation2 + $0x104] ss:$8 sps:$4 sm:$0xff]   ;;  %v938_v21 = vld [vmem:[#allocation2] ss:$8 sps:$4 sm:$0xff]   ;;  %v941_v25 = vld [vmem:[#allocation2 + $0x10] ss:$8 sps:$4 sm:$0xff]  }
  0x18   :  { %603 = vmatprep.subr.bf16.mxu1 %v959_v19  ;;  %v971_v26 = vld [vmem:[#allocation2 + $0x124] ss:$8 sps:$4 sm:$0xff]   ;;  %v973_v28 = vld [vmem:[#allocation2 + $0x120] ss:$8 sps:$4 sm:$0xff]   ;;  %v977_v29 = vld [vmem:[#allocation2 + $0x134] ss:$8 sps:$4 sm:$0xff]  }
  0x19   :  { %122 = vmatprep.subr.bf16.mxu0 %v112_v9  ;;  %604 = vmatpush1.bf16.msra.mxu1 %v961_v20  ;;  %v946_v27 = vld [vmem:[#allocation2 + $0x24] ss:$8 sps:$4 sm:$0xff]   ;;  %v944_v30 = vld [vmem:[#allocation2 + $0x20] ss:$8 sps:$4 sm:$0xff]   ;;  %v949_v31 = vld [vmem:[#allocation2 + $0x34] ss:$8 sps:$4 sm:$0xff]  }
  0x1a   :  { %123 = vmatpush1.bf16.msra.mxu0 %v109_v10  ;;  %605 = vmatprep.subr.bf16.mxu1 %v965_v23  ;;  %v979_v32 = vld [vmem:[#allocation2 + $0x130] ss:$8 sps:$4 sm:$0xff]   ;;  %v983_v33 = vld [vmem:[#allocation2 + $0x144] ss:$8 sps:$4 sm:$0xff]   ;;  %v985_v36 = vld [vmem:[#allocation2 + $0x140] ss:$8 sps:$4 sm:$0xff]  }
  0x1b   :  { %161 = vmatprep.subr.bf16.mxu0 %v935_v11  ;;  %v947_v34 = vld [vmem:[#allocation2 + $0x30] ss:$8 sps:$4 sm:$0xff]   ;;  %v952_v35 = vld [vmem:[#allocation2 + $0x44] ss:$8 sps:$4 sm:$0xff]   ;;  %v989_v37 = vld [vmem:[#allocation2 + $0x154] ss:$8 sps:$4 sm:$0xff]   ;;  %v51_v11 = vlaneseq }
  0x1c   :  { %v950_v38 = vld [vmem:[#allocation2 + $0x40] ss:$8 sps:$4 sm:$0xff]   ;;  %v955_v39 = vld [vmem:[#allocation2 + $0x54] ss:$8 sps:$4 sm:$0xff]   ;;  %v991_v40 = vld [vmem:[#allocation2 + $0x150] ss:$8 sps:$4 sm:$0xff]  }
  0x1d   :  { %813 = vmatmul.mubr.msk.bf16.vlgmr.msra.gmra.mrb[0].mxu0 %vm101_vm1, %v42_v13  ;;  %606 = vmatpush1.bf16.msra.mxu1 %v967_v24  ;;  %v953_v41 = vld [vmem:[#allocation2 + $0x50] ss:$8 sps:$4 sm:$0xff]   ;;  %v995_v42 = vld [vmem:[#allocation2 + $0x164] ss:$8 sps:$4 sm:$0xff]   ;;  %v997_v44 = vld [vmem:[#allocation2 + $0x160] ss:$8 sps:$4 sm:$0xff]  }
  0x1e   :  { %162 = vmatpush1.bf16.msra.mxu0 %v933_v14  ;;  %193 = vmatprep.mubr.bf16.mxu0 %v1059_v0  ;;  %v958_v43 = vld [vmem:[#allocation2 + $0x64] ss:$8 sps:$4 sm:$0xff]   ;;  %v1001_v45 = vld [vmem:[#allocation2 + $0x174] ss:$8 sps:$4 sm:$0xff]   ;;  %v956_v46 = vld [vmem:[#allocation2 + $0x60] ss:$8 sps:$4 sm:$0xff]  }
  0x1f   :  { %163 = vmatprep.subr.bf16.mxu0 %v118_v16  ;;  %607 = vmatprep.subr.bf16.mxu1 %v971_v26  ;;  %v964_v47 = vld [vmem:[#allocation2 + $0x74] ss:$8 sps:$4 sm:$0xff]   ;;  %v1003_v48 = vld [vmem:[#allocation2 + $0x170] ss:$8 sps:$4 sm:$0xff]   ;;  %v970_v50 = vld [vmem:[#allocation2 + $0x84] ss:$8 sps:$4 sm:$0xff]  }
  0x20   :  { %v962_v49 = vld [vmem:[#allocation2 + $0x70] ss:$8 sps:$4 sm:$0xff]   ;;  %v968_v51 = vld [vmem:[#allocation2 + $0x80] ss:$8 sps:$4 sm:$0xff]   ;;  %v976_v52 = vld [vmem:[#allocation2 + $0x94] ss:$8 sps:$4 sm:$0xff]  }
  0x21   :  { %608 = vmatpush1.bf16.msra.mxu1 %v973_v28  ;;  %v974_v53 = vld [vmem:[#allocation2 + $0x90] ss:$8 sps:$4 sm:$0xff]   ;;  %v982_v54 = vld [vmem:[#allocation2 + $0xa4] ss:$8 sps:$4 sm:$0xff]   ;;  %v980_v55 = vld [vmem:[#allocation2 + $0xa0] ss:$8 sps:$4 sm:$0xff]  }
  0x22   :  { %164 = vmatpush1.bf16.msra.mxu0 %v115_v17  ;;  %609 = vmatprep.subr.bf16.mxu1 %v977_v29  ;;  %v988_v56 = vld [vmem:[#allocation2 + $0xb4] ss:$8 sps:$4 sm:$0xff]   ;;  %v986_v57 = vld [vmem:[#allocation2 + $0xb0] ss:$8 sps:$4 sm:$0xff]   ;;  %v994_v58 = vld [vmem:[#allocation2 + $0xc4] ss:$8 sps:$4 sm:$0xff]  }
  0x23   :  { %562 = vmatprep.subr.bf16.mxu0 %v940_v18  ;;  %v992_v59 = vld [vmem:[#allocation2 + $0xc0] ss:$8 sps:$4 sm:$0xff]   ;;  %v1000_v60 = vld [vmem:[#allocation2 + $0xd4] ss:$8 sps:$4 sm:$0xff]   ;;  %v998_v61 = vld [vmem:[#allocation2 + $0xd0] ss:$8 sps:$4 sm:$0xff]  }
  0x24   :  { %v1006_v62 = vld [vmem:[#allocation2 + $0xe4] ss:$8 sps:$4 sm:$0xff]   ;;  %v1004_v0 = vld [vmem:[#allocation2 + $0xe0] ss:$8 sps:$4 sm:$0xff]   ;;  %v1012_v2 = vld [vmem:[#allocation2 + $0xf4] ss:$8 sps:$4 sm:$0xff]  }
  0x25   :  { %814 = vmatmul.mubr.msk.bf16.vlgmr.msra.gmra.mrb[4].mxu0 %vm101_vm1, %v42_v13  ;;  %610 = vmatpush1.bf16.msra.mxu1 %v979_v32  ;;  %v1007_v63 = vld [vmem:[#allocation2 + $0x184] ss:$8 sps:$4 sm:$0xff]   ;;  %v1009_v1 = vld [vmem:[#allocation2 + $0x180] ss:$8 sps:$4 sm:$0xff]   ;;  %v1013_v3 = vld [vmem:[#allocation2 + $0x194] ss:$8 sps:$4 sm:$0xff]  }
  0x26   :  { %563 = vmatpush1.bf16.msra.mxu0 %v938_v21  ;;  %611 = vmatprep.subr.bf16.mxu1 %v983_v33  ;;  %v1010_v4 = vld [vmem:[#allocation2 + $0xf0] ss:$8 sps:$4 sm:$0xff]   ;;  %v1016_v6 = vld [vmem:[#allocation2 + $0x1a4] ss:$8 sps:$4 sm:$0xff]   ;;  %v1018_v7 = vld [vmem:[#allocation2 + $0x1a0] ss:$8 sps:$4 sm:$0xff]  }
  0x27   :  { %564 = vmatprep.subr.bf16.mxu0 %v943_v22  ;;  %v1015_v5 = vld [vmem:[#allocation2 + $0x190] ss:$8 sps:$4 sm:$0xff]   ;;  %v1019_v8 = vld [vmem:[#allocation2 + $0x1b4] ss:$8 sps:$4 sm:$0xff]   ;;  %v1060_v10 = vmov 0.0|0.0   ;;  %v1140_v12 = vshrl.u32 %v51_v11, 7 }
  0x28   :  { %v1021_v9 = vld [vmem:[#allocation2 + $0x1b0] ss:$8 sps:$4 sm:$0xff]   ;;  %v49_v14 = vld [vmem:[%s1266_s2] sm:$0xf]  ;;  %vm681_vm3 = vcmask 785408   ;;  %s1062_s10 = smov 120  }
  0x29   :  { %612 = vmatpush1.bf16.msra.mxu1 %v985_v36  ;;  %v53_v13 = vsub.s32 0, %v1140_v12  ;;  %v57_v15 = vsub.s32 1, %v1140_v12  ;;  %v61_v21 = vsub.s32 2, %v1140_v12  ;;  %v65_v24 = vsub.s32 3, %v1140_v12 }
  0x2a   :  { %565 = vmatpush1.bf16.msra.mxu0 %v941_v25  ;;  %613 = vmatprep.subr.bf16.mxu1 %v989_v37  ;;  %vm798_vm6 = vcmask 31744  }
  0x2b   :  { %566 = vmatprep.subr.bf16.mxu0 %v946_v27  ;;  %v54_v16 = vrot.slane %v49_v14, %v53_v13  ;;  %v58_v17 = vrot.slane %v49_v14, %v57_v15  ;;  %v62_v28 = vrot.slane %v49_v14, %v61_v21  ;;  %v672_v21 = vld [vmem:[%s1269_s5 + $0xd0] sm:$0xff] }
  0x2d   :  { %614 = vmatpush1.bf16.msra.mxu1 %v991_v40  ;;  %v647_v40 = vld [vmem:[%s1269_s5 + $0x8] sm:$0xff] }
  0x2e   :  { %567 = vmatpush1.bf16.msra.mxu0 %v944_v30  ;;  %615 = vmatprep.subr.bf16.mxu1 %v995_v42  ;;  %v66_v30 = vrot.slane %v49_v14, %v65_v24  ;;  %v668_v14 = vld [vmem:[%s1269_s5 + $0xb0] sm:$0xff]  ;;  %v266_v24 = vld [vmem:[%s1268_s4] sm:$0x3] }
  0x2f   :  { %568 = vmatprep.subr.bf16.mxu0 %v949_v31 }
  0x31   :  { %616 = vmatpush1.bf16.msra.mxu1 %v997_v44 }
  0x32   :  { %569 = vmatpush1.bf16.msra.mxu0 %v947_v34  ;;  %617 = vmatprep.subr.bf16.mxu1 %v1001_v45  ;;  %v648_v45 = vld [vmem:[%s1269_s5 + $0x10] sm:$0xff] }
  0x33   :  { %570 = vmatprep.subr.bf16.mxu0 %v952_v35 }
  0x35   :  { %618 = vmatpush1.bf16.msra.mxu1 %v1003_v48  ;;  %v650_v48 = vld [vmem:[%s1269_s5 + $0x20] sm:$0xff] }
  0x36   :  { %571 = vmatpush1.bf16.msra.mxu0 %v950_v38  ;;  %619 = vmatprep.subr.bf16.mxu1 %v1007_v63  ;;  %v660_v63 = vld [vmem:[%s1269_s5 + $0x70] sm:$0xff] }
  0x37   :  { %572 = vmatprep.subr.bf16.mxu0 %v955_v39  ;;  %v646_v39 = vld [vmem:[%s1269_s5] sm:$0xff] }
  0x39   :  { %620 = vmatpush1.bf16.msra.mxu1 %v1009_v1 }
  0x3a   :  { %573 = vmatpush1.bf16.msra.mxu0 %v953_v41  ;;  %621 = vmatprep.subr.bf16.mxu1 %v1013_v3  ;;  %v663_v3 = vld [vmem:[%s1269_s5 + $0x88] sm:$0xff] }
  0x3b   :  { %574 = vmatprep.subr.bf16.mxu0 %v958_v43  ;;  %v876_v43 = vpack.c.bf16 %v647_v40, %v646_v39 }
  0x3d   :  { %622 = vmatpush1.bf16.msra.mxu1 %v1015_v5  ;;  %v664_v5 = vld [vmem:[%s1269_s5 + $0x90] sm:$0xff] }
  0x3e   :  { %575 = vmatpush1.bf16.msra.mxu0 %v956_v46  ;;  %623 = vmatprep.subr.bf16.mxu1 %v1016_v6  ;;  %v649_v46 = vld [vmem:[%s1269_s5 + $0x18] sm:$0xff] }
  0x3f   :  { %576 = vmatprep.subr.bf16.mxu0 %v964_v47  ;;  %v879_v47 = vpack.c.bf16 %v649_v46, %v648_v45  ;;  %v665_v6 = vld [vmem:[%s1269_s5 + $0x98] sm:$0xff] }
  0x41   :  { %624 = vmatpush1.bf16.msra.mxu1 %v1018_v7  ;;  %v903_v7 = vpack.c.bf16 %v665_v6, %v664_v5 }
  0x42   :  { %577 = vmatpush1.bf16.msra.mxu0 %v962_v49  ;;  %625 = vmatprep.subr.bf16.mxu1 %v1019_v8  ;;  %v651_v49 = vld [vmem:[%s1269_s5 + $0x28] sm:$0xff]  ;;  %v666_v8 = vld [vmem:[%s1269_s5 + $0xa0] sm:$0xff] }
  0x43   :  { %578 = vmatprep.subr.bf16.mxu0 %v970_v50  ;;  %v882_v50 = vpack.c.bf16 %v651_v49, %v650_v48 }
  0x45   :  { %626 = vmatpush1.bf16.msra.mxu1 %v1021_v9  ;;  %v667_v9 = vld [vmem:[%s1269_s5 + $0xa8] sm:$0xff] }
  0x46   :  { %579 = vmatpush1.bf16.msra.mxu0 %v968_v51  ;;  %875 = vmatprep.subr.bf16.mxu1 %v1060_v10  ;;  %v652_v51 = vld [vmem:[%s1269_s5 + $0x30] sm:$0xff]  ;;  %v906_v11 = vpack.c.bf16 %v667_v9, %v666_v8 }
  0x47   :  { %580 = vmatprep.subr.bf16.mxu0 %v976_v52  ;;  %v653_v52 = vld [vmem:[%s1269_s5 + $0x38] sm:$0xff] }
  0x4a   :  { %581 = vmatpush1.bf16.msra.mxu0 %v974_v53  ;;  %v885_v53 = vpack.c.bf16 %v653_v52, %v652_v51 }
  0x4b   :  { %582 = vmatprep.subr.bf16.mxu0 %v982_v54  ;;  %v654_v54 = vld [vmem:[%s1269_s5 + $0x40] sm:$0xff] }
  0x4e   :  { %583 = vmatpush1.bf16.msra.mxu0 %v980_v55  ;;  %v655_v55 = vld [vmem:[%s1269_s5 + $0x48] sm:$0xff] }
  0x4f   :  { %584 = vmatprep.subr.bf16.mxu0 %v988_v56  ;;  %v888_v56 = vpack.c.bf16 %v655_v55, %v654_v54 }
  0x52   :  { %585 = vmatpush1.bf16.msra.mxu0 %v986_v57  ;;  %v656_v57 = vld [vmem:[%s1269_s5 + $0x50] sm:$0xff] }
  0x53   :  { %586 = vmatprep.subr.bf16.mxu0 %v994_v58  ;;  %v657_v58 = vld [vmem:[%s1269_s5 + $0x58] sm:$0xff] }
  0x56   :  { %587 = vmatpush1.bf16.msra.mxu0 %v992_v59  ;;  %v891_v59 = vpack.c.bf16 %v657_v58, %v656_v57 }
  0x57   :  { %588 = vmatprep.subr.bf16.mxu0 %v1000_v60  ;;  %v658_v60 = vld [vmem:[%s1269_s5 + $0x60] sm:$0xff] }
  0x5a   :  { %589 = vmatpush1.bf16.msra.mxu0 %v998_v61  ;;  %v659_v61 = vld [vmem:[%s1269_s5 + $0x68] sm:$0xff] }
  0x5b   :  { %590 = vmatprep.subr.bf16.mxu0 %v1006_v62  ;;  %v894_v62 = vpack.c.bf16 %v659_v61, %v658_v60 }
  0x5e   :  { %591 = vmatpush1.bf16.msra.mxu0 %v1004_v0  ;;  %v661_v0 = vld [vmem:[%s1269_s5 + $0x78] sm:$0xff] }
  0x5f   :  { %592 = vmatprep.subr.bf16.mxu0 %v1012_v2  ;;  %v897_v1 = vpack.c.bf16 %v661_v0, %v660_v63  ;;  %v662_v2 = vld [vmem:[%s1269_s5 + $0x80] sm:$0xff] }
  0x62   :  { %593 = vmatpush1.bf16.msra.mxu0 %v1010_v4  ;;  %v900_v4 = vpack.c.bf16 %v663_v3, %v662_v2 }
  0xf0   :  { %v154_v18 = vpop.f32.mrb[0].mxu0 }
  0xf1   :  { %v155_v19 = vadd.f32 %v154_v18, %v54_v16  ;;  %v156_v20 = vpop.f32.mrb[1].mxu0  ;;  %v669_v16 = vld [vmem:[%s1269_s5 + $0xb8] sm:$0xff]  ;;  %v670_v18 = vld [vmem:[%s1269_s5 + $0xc0] sm:$0xff] }
  0xf2   :  { %v157_v22 = vadd.f32 %v156_v20, %v58_v17  ;;  %v158_v23 = vpop.f32.mrb[2].mxu0  ;;  %v909_v17 = vpack.c.bf16 %v669_v16, %v668_v14 }
  0xf3   :  { %v202_v25 = vmax.f32 %v155_v19, 0.0  ;;  %v159_v26 = vpop.f32.mrb[3].mxu0  ;;  %v671_v19 = vld [vmem:[%s1269_s5 + $0xc8] sm:$0xff] }
  0xf4   :  { %v203_v27 = vmax.f32 %v157_v22, 0.0  ;;  %v912_v20 = vpack.c.bf16 %v671_v19, %v670_v18  ;;  %v673_v22 = vld [vmem:[%s1269_s5 + $0xd8] sm:$0xff] }
  0xf5   :  { %v206_v31 = vpack.c.bf16 %v202_v25, %v202_v25  ;;  %v915_v23 = vpack.c.bf16 %v673_v22, %v672_v21 }
  0xf6   :  { %v207_v29 = vpack.c.bf16 %v203_v27, %v203_v27 }
  0xf8   :  { %v195_v32 = vpop.f32.mrb[4].mxu0  ;;  %594 = vmatprep.mubr.bf16.mxu0 %v207_v29  ;;  %v275_v29 = vrot.slane %v266_v24, %v57_v15 }
  0xf9   :  { %v196_v33 = vadd.f32 %v195_v32, %v62_v28  ;;  %v197_v34 = vpop.f32.mrb[5].mxu0  ;;  %595 = vmatmul.mubr.bf16.vlgmr.msra.gmra.mrb[8].mxu0 %v206_v31 }
  0xfa   :  { %v198_v35 = vadd.f32 %v197_v34, %v66_v30  ;;  %v199_v36 = vpop.f32.mrb[6].mxu0 }
  0xfb   :  { %v204_v37 = vmax.f32 %v196_v33, 0.0  ;;  %v200_v38 = vpop.f32.mrb[7].mxu0 }
  0xfc   :  { %v205_v41 = vmax.f32 %v198_v35, 0.0 }
  0xfd   :  { %v208_v44 = vpack.c.bf16 %v204_v37, %v204_v37 }
  0xfe   :  { %v209_v42 = vpack.c.bf16 %v205_v41, %v205_v41 }
 0x100   :  { %871 = vmatprep.mubr.msk.bf16.mxu1 %vm558_vm2, %v209_v42 }
 0x101   :  { %636 = vmatmul.mubr.bf16.vlgmr.msra.gmra.mrb[0].mxu1 %v208_v44 }
 0x102   :  { %877 = vmatpush1.bf16.msra.mxu1 %v876_v43 }
 0x103   :  { %878 = vmatprep.subr.bf16.mxu1 %v1060_v10 }
 0x106   :  { %880 = vmatpush1.bf16.msra.mxu1 %v879_v47 }
 0x107   :  { %881 = vmatprep.subr.bf16.mxu1 %v1060_v10 }
 0x10a   :  { %883 = vmatpush1.bf16.msra.mxu1 %v882_v50 }
 0x10b   :  { %884 = vmatprep.subr.bf16.mxu1 %v1060_v10 }
 0x10e   :  { %886 = vmatpush1.bf16.msra.mxu1 %v885_v53 }
 0x10f   :  { %887 = vmatprep.subr.bf16.mxu1 %v1060_v10 }
 0x112   :  { %889 = vmatpush1.bf16.msra.mxu1 %v888_v56 }
 0x113   :  { %890 = vmatprep.subr.bf16.mxu1 %v1060_v10 }
 0x116   :  { %892 = vmatpush1.bf16.msra.mxu1 %v891_v59 }
 0x117   :  { %893 = vmatprep.subr.bf16.mxu1 %v1060_v10 }
 0x11a   :  { %895 = vmatpush1.bf16.msra.mxu1 %v894_v62 }
 0x11b   :  { %896 = vmatprep.subr.bf16.mxu1 %v1060_v10 }
 0x11e   :  { %898 = vmatpush1.bf16.msra.mxu1 %v897_v1 }
 0x11f   :  { %899 = vmatprep.subr.bf16.mxu1 %v1060_v10 }
 0x122   :  { %901 = vmatpush1.bf16.msra.mxu1 %v900_v4 }
 0x123   :  { %902 = vmatprep.subr.bf16.mxu1 %v1060_v10 }
 0x126   :  { %904 = vmatpush1.bf16.msra.mxu1 %v903_v7 }
 0x127   :  { %905 = vmatprep.subr.bf16.mxu1 %v1060_v10 }
 0x12a   :  { %907 = vmatpush1.bf16.msra.mxu1 %v906_v11 }
 0x12b   :  { %908 = vmatprep.subr.bf16.mxu1 %v1060_v10 }
 0x12e   :  { %910 = vmatpush1.bf16.msra.mxu1 %v909_v17 }
 0x12f   :  { %911 = vmatprep.subr.bf16.mxu1 %v1060_v10 }
 0x132   :  { %913 = vmatpush1.bf16.msra.mxu1 %v912_v20 }
 0x133   :  { %914 = vmatprep.subr.bf16.mxu1 %v1060_v10  ;;  %v271_v10 = vrot.slane %v266_v24, %v53_v13  ;;  %v872_v13 = vld [vmem:[%s1270_s6] ss:$0 sm:$0xff]  ;;  %s1061_s6 = smov 4  }
 0x136   :  { %916 = vmatpush1.bf16.msra.mxu1 %v915_v23 }
 0x1cc   :  { %v596_v25 = vpop.f32.mrb[8].mxu0 }
 0x1cd   :  { %v598_v26 = vpop.f32.mrb[9].mxu0  ;;  %v597_v30 = vadd.f32 %v596_v25, %v271_v10 }
 0x1ce   :  { %v600_v27 = vpop.f32.mrb[10].mxu0  ;;  %v599_v31 = vadd.f32 %v598_v26, %v275_v29 }
 0x1cf   :  { %v601_v28 = vpop.f32.mrb[11].mxu0 }
 0x1d4   :  { %v637_v32 = vpop.f32.mrb[0].mxu1 }
 0x1d5   :  { %v638_v33 = vadd.f32 %v637_v32, %v597_v30  ;;  %v639_v34 = vpop.f32.mrb[1].mxu1 }
 0x1d6   :  { %v640_v35 = vadd.f32 %v639_v34, %v599_v31  ;;  %v641_v36 = vpop.f32.mrb[2].mxu1 }
 0x1d7   :  { %v642_v37 = vpop.f32.mrb[3].mxu1  ;;  %v644_v39 = vmax.f32 %v638_v33, 0.0 }
 0x1d8   :  { %v645_v38 = vmax.f32 %v640_v35, 0.0 }
 0x1da   :  { %873 = vmatprep.mubr.msk.f32.mxu1 %vm681_vm3, %v645_v38 }
 0x1db   :  { %750 = vmatmul.mubr.f32.vlgmr.msra.gmra.mrb[4].mxu1 %v644_v39 }
 0x2ae   :  { %v751_v40 = vpop.f32.mrb[4].mxu1 }
 0x2af   :  { %v752_v12 = vadd.f32 %v872_v13, %v751_v40  ;;  %v753_v15 = vpop.f32.mrb[5].mxu1 }
 0x2b1   :  { %v758_v41 = vand.u32 2147483647, %v752_v12  ;;  %v874_v42 = vmul.f32 -1.442695, %v752_v12  ;;  %v755_v55 = vmax.f32 %v752_v12, 0.0  ;;  %vm756_vm5 = vcmp.ne.f32.partialorder %v752_v12, %v752_v12 }
 0x2b2   :  { %v782_v63 = vmul.f32 1.442695, %v752_v12 }
 0x2b3   :  { %v759_v43 = vsub.f32 0.0, %v758_v41  ;;  %1022 = vpow2.f32 %v874_v42 }
 0x2b5   :  { %v760_v44 = vmul.f32 1.442695, %v759_v43 }
 0x2b7   :  { %1024 = vpow2.f32 %v760_v44 }
 0x2bd   :  { %v1023_v45 = vpop.eup %1022 }
 0x2be   :  { %v777_v48 = vadd.f32 1.0, %v1023_v45 }
 0x2c1   :  { %v1025_v46 = vpop.eup %1024 }
 0x2c2   :  { %v762_v47 = vadd.f32 1.0, %v1025_v46  ;;  %v765_v49 = vmul.f32 -0.5, %v1025_v46  ;;  %v768_v51 = vand.u32 2147483647, %v1025_v46 }
 0x2c4   :  { %1026 = vlog2.f32 %v762_v47  ;;  %v766_v50 = vadd.f32 1.0, %v765_v49  ;;  %vm769_vm4 = vcmp.lt.f32.partialorder %v768_v51, 0.0004427343 }
 0x2c5   :  { %1028 = vrcp.f32 %v777_v48 }
 0x2c6   :  { %v767_v54 = vmul.f32 %v1025_v46, %v766_v50  ;;  %1030 = vpow2.f32 %v782_v63 }
 0x2ce   :  { %v1027_v52 = vpop.eup %1026 }
 0x2cf   :  { %v764_v53 = vmul.f32 0.6931472, %v1027_v52  ;;  %v1029_v57 = vpop.eup %1028 }
 0x2d0   :  { %v780_v61 = vmul.f32 2.0, %v1029_v57  ;;  %v1031_v1 = vpop.eup %1030 }
 0x2d1   :  { %v770_v56 = vsel %vm769_vm4, %v767_v54, %v764_v53 }
 0x2d2   :  { %v771_v58 = vadd.f32 %v770_v56, %v755_v55  ;;  %v781_v62 = vadd.f32 0.5, %v780_v61 }
 0x2d4   :  { %v772_v59 = vsel %vm756_vm5, %v752_v12, %v771_v58 }
 0x2d5   :  { %v773_v60 = vadd.f32 1.0, %v772_v59 }
 0x2d7   :  { %785 = vrot.lane.b32.xlu0 %v773_v60, %s1058_s12 }
 0x2db   :  { %790 = vrot.lane.b32.xlu0 %v781_v62, %s1061_s6 }
 0x349   :  { %v786_v0 = vpop.permute.xlu0 %785 }
 0x34a   :  { %v788_v2 = vmul.f32 %v1031_v1, %v786_v0 }
 0x34d   :  { %v791_v3 = vpop.permute.xlu0 %790 }
 0x34e   :  { %v793_v4 = vmul.f32 %v791_v3, %v788_v2 }
 0x350   :  { %795 = vrot.lane.b32.xlu1 %v793_v4, %s1062_s10 }
 0x3c2   :  { %v796_v5 = vpop.permute.xlu1 %795 }
 0x3c3   :  { %799 = vst.msk [vmem:[%s1271_s7] sm:$0xff] %vm798_vm6, %v796_v5 }
 0x3c4   :  { %804 = vsyncpa [#allocation3], 1 }

</bundles_post_ra>
